<compile_context>
chip_gen: v6e
topology: v6e:2x2x1
jax: 0.10.0
libtpu: 0.0.40
codegen_flags: <defaults>
</compile_context>

<pallas_src>
import functools

import jax
import jax.numpy as jnp
from jax import lax
from jax.experimental import pallas as pl
from jax.experimental.pallas import tpu as pltpu


# ---------------------------------------------------------------------------
# Fused Pallas kernel: gated activation + cumulative LayerNorm + PReLU
# ---------------------------------------------------------------------------
def _gate_cln_prelu_kernel(ab_ref, p_ref, o_ref, *, eps, cf):
    # ab_ref: (1, T, 2*CF) block, lanes [0:CF] = main conv, [CF:2CF] = gate.
    # p_ref : (3, CF)      packed [gain; bias; alpha], channel-major lanes.
    # o_ref : (1, T, CF)
    ab = ab_ref[0].astype(jnp.float32)                        # (T, 2CF)
    a = ab[:, :cf]                                            # (T, CF)
    g = ab[:, cf:]                                            # (T, CF)
    t = a.shape[0]

    # Gated activation:  y = conv * sigmoid(gate_conv)   (exp on EUP slot)
    y = a * jax.nn.sigmoid(g)                                 # (T, CF)

    # Per-time-step statistics over (C, F)  (lane reduction).
    s1 = jnp.sum(y, axis=-1, keepdims=True)                   # (T, 1)
    s2 = jnp.sum(y * y, axis=-1, keepdims=True)               # (T, 1)
    s12 = jnp.concatenate([s1, s2], axis=-1)                  # (T, 2)

    # Cumulative sums over time via ONE lower-triangular matmul.
    row = lax.broadcasted_iota(jnp.int32, (t, t), 0)
    col = lax.broadcasted_iota(jnp.int32, (t, t), 1)
    tril = (row >= col).astype(jnp.float32)                   # (T, T)
    cum = jnp.dot(tril, s12, preferred_element_type=jnp.float32)  # (T, 2)
    cum_sum = cum[:, 0:1]                                     # (T, 1)
    cum_pow = cum[:, 1:2]                                     # (T, 1)

    # entry count at step t = C * F * (t + 1)
    cnt = (lax.broadcasted_iota(jnp.int32, (t, 1), 0).astype(jnp.float32)
           + 1.0) * float(cf)                                 # (T, 1)

    cum_mean = cum_sum / cnt
    cum_var = (cum_pow - 2.0 * cum_mean * cum_sum) / cnt + cum_mean * cum_mean
    cum_var = jnp.maximum(cum_var, 0.0)                       # cancellation guard
    inv_std = lax.rsqrt(cum_var + eps)                        # (T, 1)

    x_hat = (y - cum_mean) * inv_std                          # (T, CF)

    p = p_ref[...]                                            # (3, CF)
    gain, bias, alpha = p[0:1, :], p[1:2, :], p[2:3, :]
    out = x_hat * gain + bias                                 # cLN affine
    out = jnp.where(out >= 0.0, out, alpha * out)             # PReLU
    o_ref[0] = out.astype(o_ref.dtype)


def gate_cln_prelu(ab, gain, bias, alpha, *, eps=1e-5):
    """ab: (B, T, 2*C, F) fused conv output (main channels first).

    Params gain/bias/alpha are (C,). Returns (B, T, C, F).
    """
    B, T, C2, F = ab.shape
    C = C2 // 2
    CF = C * F

    # Free reshape: lanes are channel-major (c*F + f); main = [0,CF), gate = [CF,2CF).
    ab2 = ab.reshape(B, T, 2 * CF)

    # One packed param buffer (3, CF): per-channel values repeated along F.
    params = jnp.stack([
        jnp.repeat(gain.astype(jnp.float32), F),
        jnp.repeat(bias.astype(jnp.float32), F),
        jnp.repeat(alpha.astype(jnp.float32), F),
    ], axis=0)                                                # (3, CF)

    feat_spec = pl.BlockSpec((1, T, 2 * CF), lambda b: (b, 0, 0))
    par_spec = pl.BlockSpec((3, CF), lambda b: (0, 0))
    out_spec = pl.BlockSpec((1, T, CF), lambda b: (b, 0, 0))

    cost = pl.CostEstimate(
        flops=int(12 * B * T * CF + 4 * B * T * T),
        transcendentals=int(B * T * CF),
        bytes_accessed=int(4 * (B * T * 2 * CF + B * T * CF + 3 * CF)),
    )

    # grid=(B,), "parallel": with B=2 this is 2-way across v7x's TensorCores
    # and only 2 (cheap) grid steps on single-TC v5e/v6e.
    out2 = pl.pallas_call(
        functools.partial(_gate_cln_prelu_kernel, eps=eps, cf=CF),
        out_shape=jax.ShapeDtypeStruct((B, T, CF), ab.dtype),
        grid_spec=pltpu.PrefetchScalarGridSpec(
            num_scalar_prefetch=0,
            grid=(B,),
            in_specs=[feat_spec, par_spec],
            out_specs=out_spec,
        ),
        compiler_params=pltpu.CompilerParams(
            dimension_semantics=("parallel",),
        ),
        cost_estimate=cost,
    )(ab2, params)

    return out2.reshape(B, T, C, F)


# ---------------------------------------------------------------------------
# Encoder blocks (fused main+gate conv via XLA, fused tail via Pallas)
# ---------------------------------------------------------------------------
def _pad_time_ntcf(x):
    # nn.ConstantPad2d((0, 0, 1, 0)): one zero frame at the start of time.
    return jnp.pad(x, ((0, 0), (1, 0), (0, 0), (0, 0)))


def _conv2d_fused_ntcf(x, w, b, stride):
    # x: (B, T, Cin, F);  w: (kT, kF, Cin, 2*Cout) HWIO;  b: (2*Cout,)
    y = lax.conv_general_dilated(
        x, w, window_strides=stride, padding="VALID",
        dimension_numbers=("NHCW", "HWIO", "NHCW"))
    return y + b.reshape(1, 1, -1, 1)


def encoder_block(x_ntcf, p, *, eps=1e-5):
    xp = _pad_time_ntcf(x_ntcf)
    ab = _conv2d_fused_ntcf(xp, p["w"], p["b"], (1, 2))       # (B, T, 2C, F')
    return gate_cln_prelu(ab, p["gain"], p["bias"], p["alpha"], eps=eps)


def unet_encoder_forward(x_nchw, params, eps=1e-5):
    """x_nchw: (B, C, T, F) as in the PyTorch module. Returns NCHW outputs."""
    x = jnp.transpose(x_nchw, (0, 2, 1, 3))                   # -> (B, T, C, F), once
    en_list = []
    for p in params:
        x = encoder_block(x, p, eps=eps)
        en_list.append(jnp.transpose(x, (0, 2, 1, 3)))        # NCHW for the output list
    return en_list[-1], en_list


def init_unet_encoder_params(key, k1=(2, 3), c=4, dtype=jnp.float32):
    layer_specs = [
        (2, c, (2, 5)),
        (c, c, k1),
        (c, c, k1),
        (c, c, k1),
        (c, 64, k1),
    ]
    params = []
    for cin, cout, ks in layer_specs:
        key, kw, kb = jax.random.split(key, 3)
        s = float(cin * ks[0] * ks[1]) ** -0.5
        params.append(dict(
            # Fused weight/bias: output channels = [main Cout | gate Cout].
            w=jax.random.uniform(kw, (ks[0], ks[1], cin, 2 * cout), dtype, -s, s),
            b=jax.random.uniform(kb, (2 * cout,), dtype, -s, s),
            gain=jnp.ones((cout,), dtype),          # cLN affine gain
            bias=jnp.zeros((cout,), dtype),         # cLN affine bias
            alpha=jnp.full((cout,), 0.25, dtype),   # PReLU per-channel weight
        ))
    return params


# ---------------------------------------------------------------------------
# Pure-JAX reference (mirrors the PyTorch module) for correctness checking
# ---------------------------------------------------------------------------
def _ref_conv_nchw(x, w, b, stride):
    y = lax.conv_general_dilated(
        x, w, window_strides=stride, padding="VALID",
        dimension_numbers=("NCHW", "HWIO", "NCHW"))
    return y + b.reshape(1, -1, 1, 1)


def _ref_gate_cln_prelu(a, g, gain, bias, alpha, eps=1e-5):
    y = a * jax.nn.sigmoid(g)
    B, C, T, F = y.shape
    step_sum = jnp.sum(y, axis=(1, 3), keepdims=True)
    step_pow = jnp.sum(y * y, axis=(1, 3), keepdims=True)
    cum_sum = jnp.cumsum(step_sum, axis=2)
    cum_pow = jnp.cumsum(step_pow, axis=2)
    cnt = (jnp.arange(1, T + 1, dtype=y.dtype) * (C * F)).reshape(1, 1, T, 1)
    cum_mean = cum_sum / cnt
    cum_var = (cum_pow - 2.0 * cum_mean * cum_sum) / cnt + cum_mean ** 2
    cum_std = jnp.sqrt(cum_var + eps)
    xh = (y - cum_mean) / cum_std
    out = xh * gain.reshape(1, C, 1, 1) + bias.reshape(1, C, 1, 1)
    return jnp.where(out >= 0, out, alpha.reshape(1, C, 1, 1) * out)


def _ref_unet_encoder_forward(x, params, eps=1e-5):
    en = []
    for p in params:
        xp = jnp.pad(x, ((0, 0), (0, 0), (1, 0), (0, 0)))
        cout = p["w"].shape[-1] // 2
        a = _ref_conv_nchw(xp, p["w"][..., :cout], p["b"][:cout], (1, 2))
        g = _ref_conv_nchw(xp, p["w"][..., cout:], p["b"][cout:], (1, 2))
        x = _ref_gate_cln_prelu(a, g, p["gain"], p["bias"], p["alpha"], eps)
        en.append(x)
    return x, en


if __name__ == "__main__":
    key = jax.random.PRNGKey(0)
    k_x, k_p = jax.random.split(key)

    # Small shapes consistent with the module: (B, 2, T, F) spectrogram-like
    # input; F chosen so all five stride-2 frequency downsamplings stay >= 1.
    B, T, F = 2, 8, 69
    c, k1 = 4, (2, 3)

    x = jax.random.normal(k_x, (B, 2, T, F), jnp.float32)
    params = init_unet_encoder_params(k_p, k1=k1, c=c)

    fwd = jax.jit(unet_encoder_forward)
    out, en_list = fwd(x, params)
    out = jax.block_until_ready(out)

    ref_out, ref_list = _ref_unet_encoder_forward(x, params)

    assert out.shape == ref_out.shape == (B, 64, T, 1), out.shape
    assert len(en_list) == 5
    for i, (yk, yr) in enumerate(zip(en_list, ref_list)):
        assert yk.shape == yr.shape, (i, yk.shape, yr.shape)
        assert jnp.allclose(yk, yr, atol=1e-3, rtol=1e-3), (
            f"layer {i} max-abs-diff {jnp.max(jnp.abs(yk - yr))}")

    print("KERNEL_OK")
</pallas_src>

<mosaic_0001>
module attributes {stable_mosaic.version = 11 : i64} {
  func.func @_gate_cln_prelu_kernel(%arg0: i32, %arg1: memref<1x8x264xf32, #tpu.memory_space<vmem>>, %arg2: memref<3x132xf32, #tpu.memory_space<vmem>>, %arg3: memref<1x8x132xf32, #tpu.memory_space<vmem>>) attributes {dimension_semantics = [#tpu.dimension_semantics<parallel>], iteration_bounds = array<i64: 2>, scalar_prefetch = 0 : i64, scratch_operands = 0 : i64, tpu.core_type = #tpu.core_type<tc>, window_params = [{transform_indices = @transform_0, window_bounds = array<i64: 1, 8, 264>}, {pipeline_mode = #tpu.pipeline_mode<synchronous>, transform_indices = @transform_1, window_bounds = array<i64: 3, 132>}, {transform_indices = @transform_2, window_bounds = array<i64: 1, 8, 132>}]} {
    %c0 = arith.constant 0 : index
    %c0_0 = arith.constant 0 : index
    %c0_1 = arith.constant 0 : index
    %0 = vector.load %arg1[%c0, %c0_0, %c0_1] : memref<1x8x264xf32, #tpu.memory_space<vmem>>, vector<1x8x264xf32>
    %1 = vector.shape_cast %0 : vector<1x8x264xf32> to vector<8x264xf32>
    %2 = vector.extract_strided_slice %1 {offsets = [0, 0], sizes = [8, 132], strides = [1, 1]} : vector<8x264xf32> to vector<8x132xf32>
    %3 = vector.extract_strided_slice %1 {offsets = [0, 132], sizes = [8, 132], strides = [1, 1]} : vector<8x264xf32> to vector<8x132xf32>
    %4 = arith.negf %3 : vector<8x132xf32>
    %5 = math.exp %4 : vector<8x132xf32>
    %cst = arith.constant 1.000000e+00 : f32
    %6 = vector.broadcast %cst : f32 to vector<8x132xf32>
    %7 = arith.addf %6, %5 : vector<8x132xf32>
    %8 = arith.divf %6, %7 : vector<8x132xf32>
    %9 = arith.mulf %2, %8 : vector<8x132xf32>
    %cst_2 = arith.constant dense<0.000000e+00> : vector<8xf32>
    %10 = vector.multi_reduction <add>, %9, %cst_2 [1] : vector<8x132xf32> to vector<8xf32>
    %11 = vector.shape_cast %10 : vector<8xf32> to vector<8x1xf32>
    %12 = arith.mulf %9, %9 : vector<8x132xf32>
    %cst_3 = arith.constant dense<0.000000e+00> : vector<8xf32>
    %13 = vector.multi_reduction <add>, %12, %cst_3 [1] : vector<8x132xf32> to vector<8xf32>
    %14 = vector.shape_cast %13 : vector<8xf32> to vector<8x1xf32>
    %15 = tpu.concatenate %11, %14 in 1 : vector<8x1xf32>, vector<8x1xf32> -> vector<8x2xf32>
    %16 = tpu.iota {dimensions = array<i32: 0>} : vector<8x8xi32>
    %17 = tpu.iota {dimensions = array<i32: 1>} : vector<8x8xi32>
    %18 = arith.cmpi sge, %16, %17 : vector<8x8xi32>
    %19 = arith.extui %18 : vector<8x8xi1> to vector<8x8xi32>
    %20 = arith.sitofp %19 : vector<8x8xi32> to vector<8x8xf32>
    %cst_4 = arith.constant dense<0.000000e+00> : vector<8x2xf32>
    %21 = tpu.matmul %20, %15, %cst_4 {dimension_numbers = #tpu.dot_dimension_numbers<[1], [0], [0], [1], [0, 0, 1, 1], [], []>} : vector<8x8xf32>, vector<8x2xf32>, vector<8x2xf32> -> vector<8x2xf32>
    %22 = vector.extract_strided_slice %21 {offsets = [0, 0], sizes = [8, 1], strides = [1, 1]} : vector<8x2xf32> to vector<8x1xf32>
    %23 = vector.extract_strided_slice %21 {offsets = [0, 1], sizes = [8, 1], strides = [1, 1]} : vector<8x2xf32> to vector<8x1xf32>
    %24 = tpu.iota {dimensions = array<i32: 0>} : vector<8x1xi32>
    %25 = arith.sitofp %24 : vector<8x1xi32> to vector<8x1xf32>
    %cst_5 = arith.constant 1.000000e+00 : f32
    %26 = vector.broadcast %cst_5 : f32 to vector<8x1xf32>
    %27 = arith.addf %25, %26 : vector<8x1xf32>
    %cst_6 = arith.constant 1.320000e+02 : f32
    %28 = vector.broadcast %cst_6 : f32 to vector<8x1xf32>
    %29 = arith.mulf %27, %28 : vector<8x1xf32>
    %30 = arith.divf %22, %29 : vector<8x1xf32>
    %cst_7 = arith.constant 2.000000e+00 : f32
    %31 = vector.broadcast %cst_7 : f32 to vector<8x1xf32>
    %32 = arith.mulf %31, %30 : vector<8x1xf32>
    %33 = arith.mulf %32, %22 : vector<8x1xf32>
    %34 = arith.subf %23, %33 : vector<8x1xf32>
    %35 = arith.divf %34, %29 : vector<8x1xf32>
    %36 = arith.mulf %30, %30 : vector<8x1xf32>
    %37 = arith.addf %35, %36 : vector<8x1xf32>
    %cst_8 = arith.constant 0.000000e+00 : f32
    %38 = vector.broadcast %cst_8 : f32 to vector<8x1xf32>
    %39 = arith.maximumf %37, %38 : vector<8x1xf32>
    %cst_9 = arith.constant 9.99999974E-6 : f32
    %40 = vector.broadcast %cst_9 : f32 to vector<8x1xf32>
    %41 = arith.addf %39, %40 : vector<8x1xf32>
    %42 = math.rsqrt %41 : vector<8x1xf32>
    %43 = vector.broadcast %30 : vector<8x1xf32> to vector<8x132xf32>
    %44 = arith.subf %9, %43 : vector<8x132xf32>
    %45 = vector.broadcast %42 : vector<8x1xf32> to vector<8x132xf32>
    %46 = arith.mulf %44, %45 : vector<8x132xf32>
    %c0_10 = arith.constant 0 : index
    %c0_11 = arith.constant 0 : index
    %47 = vector.load %arg2[%c0_10, %c0_11] : memref<3x132xf32, #tpu.memory_space<vmem>>, vector<3x132xf32>
    %48 = vector.extract_strided_slice %47 {offsets = [0, 0], sizes = [1, 132], strides = [1, 1]} : vector<3x132xf32> to vector<1x132xf32>
    %49 = vector.extract_strided_slice %47 {offsets = [1, 0], sizes = [1, 132], strides = [1, 1]} : vector<3x132xf32> to vector<1x132xf32>
    %50 = vector.extract_strided_slice %47 {offsets = [2, 0], sizes = [1, 132], strides = [1, 1]} : vector<3x132xf32> to vector<1x132xf32>
    %51 = vector.broadcast %48 : vector<1x132xf32> to vector<8x132xf32>
    %52 = arith.mulf %46, %51 : vector<8x132xf32>
    %53 = vector.broadcast %49 : vector<1x132xf32> to vector<8x132xf32>
    %54 = arith.addf %52, %53 : vector<8x132xf32>
    %cst_12 = arith.constant 0.000000e+00 : f32
    %55 = vector.broadcast %cst_12 : f32 to vector<8x132xf32>
    %56 = arith.cmpf oge, %54, %55 : vector<8x132xf32>
    %57 = vector.broadcast %50 : vector<1x132xf32> to vector<8x132xf32>
    %58 = arith.mulf %57, %54 : vector<8x132xf32>
    %59 = arith.select %56, %54, %58 : vector<8x132xi1>, vector<8x132xf32>
    %c0_13 = arith.constant 0 : index
    %c0_14 = arith.constant 0 : index
    %c0_15 = arith.constant 0 : index
    %60 = vector.load %arg3[%c0_13, %c0_14, %c0_15] : memref<1x8x132xf32, #tpu.memory_space<vmem>>, vector<1x8x132xf32>
    %61 = vector.shape_cast %60 : vector<1x8x132xf32> to vector<8x132xf32>
    %62 = vector.shape_cast %59 : vector<8x132xf32> to vector<1x8x132xf32>
    tpu.vector_store %arg3[%c0_13, %c0_14, %c0_15], %62 {strides = array<i32>} : memref<1x8x132xf32, #tpu.memory_space<vmem>>, vector<1x8x132xf32>,
    return
  }
  func.func @transform_0(%arg0: i32) -> (i32, i32, i32) {
    %c0_i32 = arith.constant 0 : i32
    %c0_i32_0 = arith.constant 0 : i32
    %c0_i32_1 = arith.constant 0 : i32
    return %arg0, %c0_i32, %c0_i32_0 : i32, i32, i32
  }
  func.func @transform_1(%arg0: i32) -> (i32, i32) {
    %c0_i32 = arith.constant 0 : i32
    %c0_i32_0 = arith.constant 0 : i32
    %c0_i32_1 = arith.constant 0 : i32
    return %c0_i32, %c0_i32_0 : i32, i32
  }
  func.func @transform_2(%arg0: i32) -> (i32, i32, i32) {
    %c0_i32 = arith.constant 0 : i32
    %c0_i32_0 = arith.constant 0 : i32
    %c0_i32_1 = arith.constant 0 : i32
    return %arg0, %c0_i32, %c0_i32_0 : i32, i32, i32
  }
}

module attributes {stable_mosaic.version = 11 : i64} {
  func.func @_gate_cln_prelu_kernel(%arg0: i32, %arg1: memref<1x8x128xf32, #tpu.memory_space<vmem>>, %arg2: memref<3x64xf32, #tpu.memory_space<vmem>>, %arg3: memref<1x8x64xf32, #tpu.memory_space<vmem>>) attributes {dimension_semantics = [#tpu.dimension_semantics<parallel>], iteration_bounds = array<i64: 2>, scalar_prefetch = 0 : i64, scratch_operands = 0 : i64, tpu.core_type = #tpu.core_type<tc>, window_params = [{transform_indices = @transform_0, window_bounds = array<i64: 1, 8, 128>}, {pipeline_mode = #tpu.pipeline_mode<synchronous>, transform_indices = @transform_1, window_bounds = array<i64: 3, 64>}, {transform_indices = @transform_2, window_bounds = array<i64: 1, 8, 64>}]} {
    %c0 = arith.constant 0 : index
    %c0_0 = arith.constant 0 : index
    %c0_1 = arith.constant 0 : index
    %0 = vector.load %arg1[%c0, %c0_0, %c0_1] : memref<1x8x128xf32, #tpu.memory_space<vmem>>, vector<1x8x128xf32>
    %1 = vector.shape_cast %0 : vector<1x8x128xf32> to vector<8x128xf32>
    %2 = vector.extract_strided_slice %1 {offsets = [0, 0], sizes = [8, 64], strides = [1, 1]} : vector<8x128xf32> to vector<8x64xf32>
    %3 = vector.extract_strided_slice %1 {offsets = [0, 64], sizes = [8, 64], strides = [1, 1]} : vector<8x128xf32> to vector<8x64xf32>
    %4 = arith.negf %3 : vector<8x64xf32>
    %5 = math.exp %4 : vector<8x64xf32>
    %cst = arith.constant 1.000000e+00 : f32
    %6 = vector.broadcast %cst : f32 to vector<8x64xf32>
    %7 = arith.addf %6, %5 : vector<8x64xf32>
    %8 = arith.divf %6, %7 : vector<8x64xf32>
    %9 = arith.mulf %2, %8 : vector<8x64xf32>
    %cst_2 = arith.constant dense<0.000000e+00> : vector<8xf32>
    %10 = vector.multi_reduction <add>, %9, %cst_2 [1] : vector<8x64xf32> to vector<8xf32>
    %11 = vector.shape_cast %10 : vector<8xf32> to vector<8x1xf32>
    %12 = arith.mulf %9, %9 : vector<8x64xf32>
    %cst_3 = arith.constant dense<0.000000e+00> : vector<8xf32>
    %13 = vector.multi_reduction <add>, %12, %cst_3 [1] : vector<8x64xf32> to vector<8xf32>
    %14 = vector.shape_cast %13 : vector<8xf32> to vector<8x1xf32>
    %15 = tpu.concatenate %11, %14 in 1 : vector<8x1xf32>, vector<8x1xf32> -> vector<8x2xf32>
    %16 = tpu.iota {dimensions = array<i32: 0>} : vector<8x8xi32>
    %17 = tpu.iota {dimensions = array<i32: 1>} : vector<8x8xi32>
    %18 = arith.cmpi sge, %16, %17 : vector<8x8xi32>
    %19 = arith.extui %18 : vector<8x8xi1> to vector<8x8xi32>
    %20 = arith.sitofp %19 : vector<8x8xi32> to vector<8x8xf32>
    %cst_4 = arith.constant dense<0.000000e+00> : vector<8x2xf32>
    %21 = tpu.matmul %20, %15, %cst_4 {dimension_numbers = #tpu.dot_dimension_numbers<[1], [0], [0], [1], [0, 0, 1, 1], [], []>} : vector<8x8xf32>, vector<8x2xf32>, vector<8x2xf32> -> vector<8x2xf32>
    %22 = vector.extract_strided_slice %21 {offsets = [0, 0], sizes = [8, 1], strides = [1, 1]} : vector<8x2xf32> to vector<8x1xf32>
    %23 = vector.extract_strided_slice %21 {offsets = [0, 1], sizes = [8, 1], strides = [1, 1]} : vector<8x2xf32> to vector<8x1xf32>
    %24 = tpu.iota {dimensions = array<i32: 0>} : vector<8x1xi32>
    %25 = arith.sitofp %24 : vector<8x1xi32> to vector<8x1xf32>
    %cst_5 = arith.constant 1.000000e+00 : f32
    %26 = vector.broadcast %cst_5 : f32 to vector<8x1xf32>
    %27 = arith.addf %25, %26 : vector<8x1xf32>
    %cst_6 = arith.constant 6.400000e+01 : f32
    %28 = vector.broadcast %cst_6 : f32 to vector<8x1xf32>
    %29 = arith.mulf %27, %28 : vector<8x1xf32>
    %30 = arith.divf %22, %29 : vector<8x1xf32>
    %cst_7 = arith.constant 2.000000e+00 : f32
    %31 = vector.broadcast %cst_7 : f32 to vector<8x1xf32>
    %32 = arith.mulf %31, %30 : vector<8x1xf32>
    %33 = arith.mulf %32, %22 : vector<8x1xf32>
    %34 = arith.subf %23, %33 : vector<8x1xf32>
    %35 = arith.divf %34, %29 : vector<8x1xf32>
    %36 = arith.mulf %30, %30 : vector<8x1xf32>
    %37 = arith.addf %35, %36 : vector<8x1xf32>
    %cst_8 = arith.constant 0.000000e+00 : f32
    %38 = vector.broadcast %cst_8 : f32 to vector<8x1xf32>
    %39 = arith.maximumf %37, %38 : vector<8x1xf32>
    %cst_9 = arith.constant 9.99999974E-6 : f32
    %40 = vector.broadcast %cst_9 : f32 to vector<8x1xf32>
    %41 = arith.addf %39, %40 : vector<8x1xf32>
    %42 = math.rsqrt %41 : vector<8x1xf32>
    %43 = vector.broadcast %30 : vector<8x1xf32> to vector<8x64xf32>
    %44 = arith.subf %9, %43 : vector<8x64xf32>
    %45 = vector.broadcast %42 : vector<8x1xf32> to vector<8x64xf32>
    %46 = arith.mulf %44, %45 : vector<8x64xf32>
    %c0_10 = arith.constant 0 : index
    %c0_11 = arith.constant 0 : index
    %47 = vector.load %arg2[%c0_10, %c0_11] : memref<3x64xf32, #tpu.memory_space<vmem>>, vector<3x64xf32>
    %48 = vector.extract_strided_slice %47 {offsets = [0, 0], sizes = [1, 64], strides = [1, 1]} : vector<3x64xf32> to vector<1x64xf32>
    %49 = vector.extract_strided_slice %47 {offsets = [1, 0], sizes = [1, 64], strides = [1, 1]} : vector<3x64xf32> to vector<1x64xf32>
    %50 = vector.extract_strided_slice %47 {offsets = [2, 0], sizes = [1, 64], strides = [1, 1]} : vector<3x64xf32> to vector<1x64xf32>
    %51 = vector.broadcast %48 : vector<1x64xf32> to vector<8x64xf32>
    %52 = arith.mulf %46, %51 : vector<8x64xf32>
    %53 = vector.broadcast %49 : vector<1x64xf32> to vector<8x64xf32>
    %54 = arith.addf %52, %53 : vector<8x64xf32>
    %cst_12 = arith.constant 0.000000e+00 : f32
    %55 = vector.broadcast %cst_12 : f32 to vector<8x64xf32>
    %56 = arith.cmpf oge, %54, %55 : vector<8x64xf32>
    %57 = vector.broadcast %50 : vector<1x64xf32> to vector<8x64xf32>
    %58 = arith.mulf %57, %54 : vector<8x64xf32>
    %59 = arith.select %56, %54, %58 : vector<8x64xi1>, vector<8x64xf32>
    %c0_13 = arith.constant 0 : index
    %c0_14 = arith.constant 0 : index
    %c0_15 = arith.constant 0 : index
    %60 = vector.load %arg3[%c0_13, %c0_14, %c0_15] : memref<1x8x64xf32, #tpu.memory_space<vmem>>, vector<1x8x64xf32>
    %61 = vector.shape_cast %60 : vector<1x8x64xf32> to vector<8x64xf32>
    %62 = vector.shape_cast %59 : vector<8x64xf32> to vector<1x8x64xf32>
    tpu.vector_store %arg3[%c0_13, %c0_14, %c0_15], %62 {strides = array<i32>} : memref<1x8x64xf32, #tpu.memory_space<vmem>>, vector<1x8x64xf32>,
    return
  }
  func.func @transform_0(%arg0: i32) -> (i32, i32, i32) {
    %c0_i32 = arith.constant 0 : i32
    %c0_i32_0 = arith.constant 0 : i32
    %c0_i32_1 = arith.constant 0 : i32
    return %arg0, %c0_i32, %c0_i32_0 : i32, i32, i32
  }
  func.func @transform_1(%arg0: i32) -> (i32, i32) {
    %c0_i32 = arith.constant 0 : i32
    %c0_i32_0 = arith.constant 0 : i32
    %c0_i32_1 = arith.constant 0 : i32
    return %c0_i32, %c0_i32_0 : i32, i32
  }
  func.func @transform_2(%arg0: i32) -> (i32, i32, i32) {
    %c0_i32 = arith.constant 0 : i32
    %c0_i32_0 = arith.constant 0 : i32
    %c0_i32_1 = arith.constant 0 : i32
    return %arg0, %c0_i32, %c0_i32_0 : i32, i32, i32
  }
}

module attributes {stable_mosaic.version = 11 : i64} {
  func.func @_gate_cln_prelu_kernel(%arg0: i32, %arg1: memref<1x8x56xf32, #tpu.memory_space<vmem>>, %arg2: memref<3x28xf32, #tpu.memory_space<vmem>>, %arg3: memref<1x8x28xf32, #tpu.memory_space<vmem>>) attributes {dimension_semantics = [#tpu.dimension_semantics<parallel>], iteration_bounds = array<i64: 2>, scalar_prefetch = 0 : i64, scratch_operands = 0 : i64, tpu.core_type = #tpu.core_type<tc>, window_params = [{transform_indices = @transform_0, window_bounds = array<i64: 1, 8, 56>}, {pipeline_mode = #tpu.pipeline_mode<synchronous>, transform_indices = @transform_1, window_bounds = array<i64: 3, 28>}, {transform_indices = @transform_2, window_bounds = array<i64: 1, 8, 28>}]} {
    %c0 = arith.constant 0 : index
    %c0_0 = arith.constant 0 : index
    %c0_1 = arith.constant 0 : index
    %0 = vector.load %arg1[%c0, %c0_0, %c0_1] : memref<1x8x56xf32, #tpu.memory_space<vmem>>, vector<1x8x56xf32>
    %1 = vector.shape_cast %0 : vector<1x8x56xf32> to vector<8x56xf32>
    %2 = vector.extract_strided_slice %1 {offsets = [0, 0], sizes = [8, 28], strides = [1, 1]} : vector<8x56xf32> to vector<8x28xf32>
    %3 = vector.extract_strided_slice %1 {offsets = [0, 28], sizes = [8, 28], strides = [1, 1]} : vector<8x56xf32> to vector<8x28xf32>
    %4 = arith.negf %3 : vector<8x28xf32>
    %5 = math.exp %4 : vector<8x28xf32>
    %cst = arith.constant 1.000000e+00 : f32
    %6 = vector.broadcast %cst : f32 to vector<8x28xf32>
    %7 = arith.addf %6, %5 : vector<8x28xf32>
    %8 = arith.divf %6, %7 : vector<8x28xf32>
    %9 = arith.mulf %2, %8 : vector<8x28xf32>
    %cst_2 = arith.constant dense<0.000000e+00> : vector<8xf32>
    %10 = vector.multi_reduction <add>, %9, %cst_2 [1] : vector<8x28xf32> to vector<8xf32>
    %11 = vector.shape_cast %10 : vector<8xf32> to vector<8x1xf32>
    %12 = arith.mulf %9, %9 : vector<8x28xf32>
    %cst_3 = arith.constant dense<0.000000e+00> : vector<8xf32>
    %13 = vector.multi_reduction <add>, %12, %cst_3 [1] : vector<8x28xf32> to vector<8xf32>
    %14 = vector.shape_cast %13 : vector<8xf32> to vector<8x1xf32>
    %15 = tpu.concatenate %11, %14 in 1 : vector<8x1xf32>, vector<8x1xf32> -> vector<8x2xf32>
    %16 = tpu.iota {dimensions = array<i32: 0>} : vector<8x8xi32>
    %17 = tpu.iota {dimensions = array<i32: 1>} : vector<8x8xi32>
    %18 = arith.cmpi sge, %16, %17 : vector<8x8xi32>
    %19 = arith.extui %18 : vector<8x8xi1> to vector<8x8xi32>
    %20 = arith.sitofp %19 : vector<8x8xi32> to vector<8x8xf32>
    %cst_4 = arith.constant dense<0.000000e+00> : vector<8x2xf32>
    %21 = tpu.matmul %20, %15, %cst_4 {dimension_numbers = #tpu.dot_dimension_numbers<[1], [0], [0], [1], [0, 0, 1, 1], [], []>} : vector<8x8xf32>, vector<8x2xf32>, vector<8x2xf32> -> vector<8x2xf32>
    %22 = vector.extract_strided_slice %21 {offsets = [0, 0], sizes = [8, 1], strides = [1, 1]} : vector<8x2xf32> to vector<8x1xf32>
    %23 = vector.extract_strided_slice %21 {offsets = [0, 1], sizes = [8, 1], strides = [1, 1]} : vector<8x2xf32> to vector<8x1xf32>
    %24 = tpu.iota {dimensions = array<i32: 0>} : vector<8x1xi32>
    %25 = arith.sitofp %24 : vector<8x1xi32> to vector<8x1xf32>
    %cst_5 = arith.constant 1.000000e+00 : f32
    %26 = vector.broadcast %cst_5 : f32 to vector<8x1xf32>
    %27 = arith.addf %25, %26 : vector<8x1xf32>
    %cst_6 = arith.constant 2.800000e+01 : f32
    %28 = vector.broadcast %cst_6 : f32 to vector<8x1xf32>
    %29 = arith.mulf %27, %28 : vector<8x1xf32>
    %30 = arith.divf %22, %29 : vector<8x1xf32>
    %cst_7 = arith.constant 2.000000e+00 : f32
    %31 = vector.broadcast %cst_7 : f32 to vector<8x1xf32>
    %32 = arith.mulf %31, %30 : vector<8x1xf32>
    %33 = arith.mulf %32, %22 : vector<8x1xf32>
    %34 = arith.subf %23, %33 : vector<8x1xf32>
    %35 = arith.divf %34, %29 : vector<8x1xf32>
    %36 = arith.mulf %30, %30 : vector<8x1xf32>
    %37 = arith.addf %35, %36 : vector<8x1xf32>
    %cst_8 = arith.constant 0.000000e+00 : f32
    %38 = vector.broadcast %cst_8 : f32 to vector<8x1xf32>
    %39 = arith.maximumf %37, %38 : vector<8x1xf32>
    %cst_9 = arith.constant 9.99999974E-6 : f32
    %40 = vector.broadcast %cst_9 : f32 to vector<8x1xf32>
    %41 = arith.addf %39, %40 : vector<8x1xf32>
    %42 = math.rsqrt %41 : vector<8x1xf32>
    %43 = vector.broadcast %30 : vector<8x1xf32> to vector<8x28xf32>
    %44 = arith.subf %9, %43 : vector<8x28xf32>
    %45 = vector.broadcast %42 : vector<8x1xf32> to vector<8x28xf32>
    %46 = arith.mulf %44, %45 : vector<8x28xf32>
    %c0_10 = arith.constant 0 : index
    %c0_11 = arith.constant 0 : index
    %47 = vector.load %arg2[%c0_10, %c0_11] : memref<3x28xf32, #tpu.memory_space<vmem>>, vector<3x28xf32>
    %48 = vector.extract_strided_slice %47 {offsets = [0, 0], sizes = [1, 28], strides = [1, 1]} : vector<3x28xf32> to vector<1x28xf32>
    %49 = vector.extract_strided_slice %47 {offsets = [1, 0], sizes = [1, 28], strides = [1, 1]} : vector<3x28xf32> to vector<1x28xf32>
    %50 = vector.extract_strided_slice %47 {offsets = [2, 0], sizes = [1, 28], strides = [1, 1]} : vector<3x28xf32> to vector<1x28xf32>
    %51 = vector.broadcast %48 : vector<1x28xf32> to vector<8x28xf32>
    %52 = arith.mulf %46, %51 : vector<8x28xf32>
    %53 = vector.broadcast %49 : vector<1x28xf32> to vector<8x28xf32>
    %54 = arith.addf %52, %53 : vector<8x28xf32>
    %cst_12 = arith.constant 0.000000e+00 : f32
    %55 = vector.broadcast %cst_12 : f32 to vector<8x28xf32>
    %56 = arith.cmpf oge, %54, %55 : vector<8x28xf32>
    %57 = vector.broadcast %50 : vector<1x28xf32> to vector<8x28xf32>
    %58 = arith.mulf %57, %54 : vector<8x28xf32>
    %59 = arith.select %56, %54, %58 : vector<8x28xi1>, vector<8x28xf32>
    %c0_13 = arith.constant 0 : index
    %c0_14 = arith.constant 0 : index
    %c0_15 = arith.constant 0 : index
    %60 = vector.load %arg3[%c0_13, %c0_14, %c0_15] : memref<1x8x28xf32, #tpu.memory_space<vmem>>, vector<1x8x28xf32>
    %61 = vector.shape_cast %60 : vector<1x8x28xf32> to vector<8x28xf32>
    %62 = vector.shape_cast %59 : vector<8x28xf32> to vector<1x8x28xf32>
    tpu.vector_store %arg3[%c0_13, %c0_14, %c0_15], %62 {strides = array<i32>} : memref<1x8x28xf32, #tpu.memory_space<vmem>>, vector<1x8x28xf32>,
    return
  }
  func.func @transform_0(%arg0: i32) -> (i32, i32, i32) {
    %c0_i32 = arith.constant 0 : i32
    %c0_i32_0 = arith.constant 0 : i32
    %c0_i32_1 = arith.constant 0 : i32
    return %arg0, %c0_i32, %c0_i32_0 : i32, i32, i32
  }
  func.func @transform_1(%arg0: i32) -> (i32, i32) {
    %c0_i32 = arith.constant 0 : i32
    %c0_i32_0 = arith.constant 0 : i32
    %c0_i32_1 = arith.constant 0 : i32
    return %c0_i32, %c0_i32_0 : i32, i32
  }
  func.func @transform_2(%arg0: i32) -> (i32, i32, i32) {
    %c0_i32 = arith.constant 0 : i32
    %c0_i32_0 = arith.constant 0 : i32
    %c0_i32_1 = arith.constant 0 : i32
    return %arg0, %c0_i32, %c0_i32_0 : i32, i32, i32
  }
}

module attributes {stable_mosaic.version = 11 : i64} {
  func.func @_gate_cln_prelu_kernel(%arg0: i32, %arg1: memref<1x8x24xf32, #tpu.memory_space<vmem>>, %arg2: memref<3x12xf32, #tpu.memory_space<vmem>>, %arg3: memref<1x8x12xf32, #tpu.memory_space<vmem>>) attributes {dimension_semantics = [#tpu.dimension_semantics<parallel>], iteration_bounds = array<i64: 2>, scalar_prefetch = 0 : i64, scratch_operands = 0 : i64, tpu.core_type = #tpu.core_type<tc>, window_params = [{transform_indices = @transform_0, window_bounds = array<i64: 1, 8, 24>}, {pipeline_mode = #tpu.pipeline_mode<synchronous>, transform_indices = @transform_1, window_bounds = array<i64: 3, 12>}, {transform_indices = @transform_2, window_bounds = array<i64: 1, 8, 12>}]} {
    %c0 = arith.constant 0 : index
    %c0_0 = arith.constant 0 : index
    %c0_1 = arith.constant 0 : index
    %0 = vector.load %arg1[%c0, %c0_0, %c0_1] : memref<1x8x24xf32, #tpu.memory_space<vmem>>, vector<1x8x24xf32>
    %1 = vector.shape_cast %0 : vector<1x8x24xf32> to vector<8x24xf32>
    %2 = vector.extract_strided_slice %1 {offsets = [0, 0], sizes = [8, 12], strides = [1, 1]} : vector<8x24xf32> to vector<8x12xf32>
    %3 = vector.extract_strided_slice %1 {offsets = [0, 12], sizes = [8, 12], strides = [1, 1]} : vector<8x24xf32> to vector<8x12xf32>
    %4 = arith.negf %3 : vector<8x12xf32>
    %5 = math.exp %4 : vector<8x12xf32>
    %cst = arith.constant 1.000000e+00 : f32
    %6 = vector.broadcast %cst : f32 to vector<8x12xf32>
    %7 = arith.addf %6, %5 : vector<8x12xf32>
    %8 = arith.divf %6, %7 : vector<8x12xf32>
    %9 = arith.mulf %2, %8 : vector<8x12xf32>
    %cst_2 = arith.constant dense<0.000000e+00> : vector<8xf32>
    %10 = vector.multi_reduction <add>, %9, %cst_2 [1] : vector<8x12xf32> to vector<8xf32>
    %11 = vector.shape_cast %10 : vector<8xf32> to vector<8x1xf32>
    %12 = arith.mulf %9, %9 : vector<8x12xf32>
    %cst_3 = arith.constant dense<0.000000e+00> : vector<8xf32>
    %13 = vector.multi_reduction <add>, %12, %cst_3 [1] : vector<8x12xf32> to vector<8xf32>
    %14 = vector.shape_cast %13 : vector<8xf32> to vector<8x1xf32>
    %15 = tpu.concatenate %11, %14 in 1 : vector<8x1xf32>, vector<8x1xf32> -> vector<8x2xf32>
    %16 = tpu.iota {dimensions = array<i32: 0>} : vector<8x8xi32>
    %17 = tpu.iota {dimensions = array<i32: 1>} : vector<8x8xi32>
    %18 = arith.cmpi sge, %16, %17 : vector<8x8xi32>
    %19 = arith.extui %18 : vector<8x8xi1> to vector<8x8xi32>
    %20 = arith.sitofp %19 : vector<8x8xi32> to vector<8x8xf32>
    %cst_4 = arith.constant dense<0.000000e+00> : vector<8x2xf32>
    %21 = tpu.matmul %20, %15, %cst_4 {dimension_numbers = #tpu.dot_dimension_numbers<[1], [0], [0], [1], [0, 0, 1, 1], [], []>} : vector<8x8xf32>, vector<8x2xf32>, vector<8x2xf32> -> vector<8x2xf32>
    %22 = vector.extract_strided_slice %21 {offsets = [0, 0], sizes = [8, 1], strides = [1, 1]} : vector<8x2xf32> to vector<8x1xf32>
    %23 = vector.extract_strided_slice %21 {offsets = [0, 1], sizes = [8, 1], strides = [1, 1]} : vector<8x2xf32> to vector<8x1xf32>
    %24 = tpu.iota {dimensions = array<i32: 0>} : vector<8x1xi32>
    %25 = arith.sitofp %24 : vector<8x1xi32> to vector<8x1xf32>
    %cst_5 = arith.constant 1.000000e+00 : f32
    %26 = vector.broadcast %cst_5 : f32 to vector<8x1xf32>
    %27 = arith.addf %25, %26 : vector<8x1xf32>
    %cst_6 = arith.constant 1.200000e+01 : f32
    %28 = vector.broadcast %cst_6 : f32 to vector<8x1xf32>
    %29 = arith.mulf %27, %28 : vector<8x1xf32>
    %30 = arith.divf %22, %29 : vector<8x1xf32>
    %cst_7 = arith.constant 2.000000e+00 : f32
    %31 = vector.broadcast %cst_7 : f32 to vector<8x1xf32>
    %32 = arith.mulf %31, %30 : vector<8x1xf32>
    %33 = arith.mulf %32, %22 : vector<8x1xf32>
    %34 = arith.subf %23, %33 : vector<8x1xf32>
    %35 = arith.divf %34, %29 : vector<8x1xf32>
    %36 = arith.mulf %30, %30 : vector<8x1xf32>
    %37 = arith.addf %35, %36 : vector<8x1xf32>
    %cst_8 = arith.constant 0.000000e+00 : f32
    %38 = vector.broadcast %cst_8 : f32 to vector<8x1xf32>
    %39 = arith.maximumf %37, %38 : vector<8x1xf32>
    %cst_9 = arith.constant 9.99999974E-6 : f32
    %40 = vector.broadcast %cst_9 : f32 to vector<8x1xf32>
    %41 = arith.addf %39, %40 : vector<8x1xf32>
    %42 = math.rsqrt %41 : vector<8x1xf32>
    %43 = vector.broadcast %30 : vector<8x1xf32> to vector<8x12xf32>
    %44 = arith.subf %9, %43 : vector<8x12xf32>
    %45 = vector.broadcast %42 : vector<8x1xf32> to vector<8x12xf32>
    %46 = arith.mulf %44, %45 : vector<8x12xf32>
    %c0_10 = arith.constant 0 : index
    %c0_11 = arith.constant 0 : index
    %47 = vector.load %arg2[%c0_10, %c0_11] : memref<3x12xf32, #tpu.memory_space<vmem>>, vector<3x12xf32>
    %48 = vector.extract_strided_slice %47 {offsets = [0, 0], sizes = [1, 12], strides = [1, 1]} : vector<3x12xf32> to vector<1x12xf32>
    %49 = vector.extract_strided_slice %47 {offsets = [1, 0], sizes = [1, 12], strides = [1, 1]} : vector<3x12xf32> to vector<1x12xf32>
    %50 = vector.extract_strided_slice %47 {offsets = [2, 0], sizes = [1, 12], strides = [1, 1]} : vector<3x12xf32> to vector<1x12xf32>
    %51 = vector.broadcast %48 : vector<1x12xf32> to vector<8x12xf32>
    %52 = arith.mulf %46, %51 : vector<8x12xf32>
    %53 = vector.broadcast %49 : vector<1x12xf32> to vector<8x12xf32>
    %54 = arith.addf %52, %53 : vector<8x12xf32>
    %cst_12 = arith.constant 0.000000e+00 : f32
    %55 = vector.broadcast %cst_12 : f32 to vector<8x12xf32>
    %56 = arith.cmpf oge, %54, %55 : vector<8x12xf32>
    %57 = vector.broadcast %50 : vector<1x12xf32> to vector<8x12xf32>
    %58 = arith.mulf %57, %54 : vector<8x12xf32>
    %59 = arith.select %56, %54, %58 : vector<8x12xi1>, vector<8x12xf32>
    %c0_13 = arith.constant 0 : index
    %c0_14 = arith.constant 0 : index
    %c0_15 = arith.constant 0 : index
    %60 = vector.load %arg3[%c0_13, %c0_14, %c0_15] : memref<1x8x12xf32, #tpu.memory_space<vmem>>, vector<1x8x12xf32>
    %61 = vector.shape_cast %60 : vector<1x8x12xf32> to vector<8x12xf32>
    %62 = vector.shape_cast %59 : vector<8x12xf32> to vector<1x8x12xf32>
    tpu.vector_store %arg3[%c0_13, %c0_14, %c0_15], %62 {strides = array<i32>} : memref<1x8x12xf32, #tpu.memory_space<vmem>>, vector<1x8x12xf32>,
    return
  }
  func.func @transform_0(%arg0: i32) -> (i32, i32, i32) {
    %c0_i32 = arith.constant 0 : i32
    %c0_i32_0 = arith.constant 0 : i32
    %c0_i32_1 = arith.constant 0 : i32
    return %arg0, %c0_i32, %c0_i32_0 : i32, i32, i32
  }
  func.func @transform_1(%arg0: i32) -> (i32, i32) {
    %c0_i32 = arith.constant 0 : i32
    %c0_i32_0 = arith.constant 0 : i32
    %c0_i32_1 = arith.constant 0 : i32
    return %c0_i32, %c0_i32_0 : i32, i32
  }
  func.func @transform_2(%arg0: i32) -> (i32, i32, i32) {
    %c0_i32 = arith.constant 0 : i32
    %c0_i32_0 = arith.constant 0 : i32
    %c0_i32_1 = arith.constant 0 : i32
    return %arg0, %c0_i32, %c0_i32_0 : i32, i32, i32
  }
}

</mosaic_0001>

<bundles_post_ra>
// kernel: unet_encoder_forward.5
= control target key start
LH: loop header
LB: loop body
LE: loop exit
PB: predicated region body
PF: predicated region fallthrough
CT: control target
= control target key end

     0   :  { %s504_s9 = smov 0   ;;  %s543_s0 = inlined_call_operand.vmem [shape: f32[2,8,264], index: 0, kind: input, shape index: {}]   ;;  %s544_s1 = inlined_call_operand.vmem [shape: f32[3,132], index: 1, kind: input, shape index: {}]   ;;  %s545_s2 = inlined_call_operand.vmem [shape: f32[2,8,132], index: 2, kind: output, shape index: {}]  }
   0x1 LB: > { %s424_s10 = sadd.s32 4294967295, %s481_s9   ;;  %p428_p0 = scmp.ge.s32.totalorder %s481_s9, 1  ;;  %s481_s9 = sphi %s504_s9, %s12_s9  }
   0x2   : > { %p112_p1 = scmp.lt.s32.totalorder %s481_s9, 3 }
   0x4   : > { %p113_p2 = pnand %p428_p0, %p112_p1 }
   0x5   : > { %p134_p3 = scmp.lt.s32.totalorder (!%p113_p2), %s424_s10, 1  ;;  %s483_s15 = smov (!%p113_p2), 124  }
   0x6   : > { %116 = sbr.rel (%p113_p2) target bundleno = 788 (0x314), region = 28  ;;  %s487_s16 = smov (!%p113_p2), 1  }
   0xb   : > { %s547_s10 = smov (!%p134_p3, %s424_s10), 1  ;;  %vm165_vm0 = vcmask 1014784   ;;  %vm171_vm1 = vcmask 31744   ;;  %v484_v22 = vmov 0.0   ;;  %vm485_vm2 = vmmov 0  }
   0xc   : > { %s446_s11 = smul.u32 24, %s547_s10  ;;  %441 = vmatprep.subr.mxu0 %v484_v22  ;;  %443 = vmatprep.mubr.msk.f32.mxu0 %vm485_vm2, %v484_v22  ;;  %v184_v23 = vlaneseq  ;;  %vm182_vm4 = vcmask 7168   ;;  %vm191_vm5 = vcmask 64512   ;;  %v486_v30 = vmov 0   ;;  %v301_v52 = vld [vmem:[%s544_s1] sm:$0x77] }
   0xd   : > { %461 = vset.pattern.permute.xlu0 %v486_v30  ;;  %v488_v41 = vmov 1   ;;  %s438_s19 = sshll.u32 %s547_s10, 4 }
   0xe   : > { %s138_s14 = scalar_lea.vmem %s543_s0, %s446_s11  ;;  %v185_v24 = vshrl.u32 %v184_v23, 7  ;;  %v187_v25 = vand.u32 127, %v184_v23  ;;  %s143_s22 = scalar_lea.vmem %s545_s2, %s438_s19 }
   0xf   : > { %v145_v0 = vld [vmem:[%s138_s14 + $0x8] sm:$0xff]  ;;  %v146_v1 = vld [vmem:[%s138_s14 + $0x10] sm:$0xff]  ;;  %v144_v11 = vld [vmem:[%s138_s14] sm:$0xff] }
  0x10   : > { %v432_v2 = vmul.f32 -1.442695, %v145_v0  ;;  %v433_v3 = vmul.f32 -1.442695, %v146_v1  ;;  %vm188_vm3 = vcmp.ge.s32.totalorder %v185_v24, %v187_v25  ;;  %v265_v31 = vcvt.s32.f32 %v185_v24 }
  0x11   : > { %v434_v28 = vsel %vm188_vm3, 1.0, %v484_v22  ;;  %v305_v50 = vsub.s32 0, %v185_v24  ;;  %v309_v51 = vsub.s32 4, %v185_v24  ;;  %v325_v53 = vsub.s32 1, %v185_v24 }
  0x12   : > { %463 = vpow2.f32 %v432_v2  ;;  %v266_v32 = vadd.f32 1.0, %v265_v31  ;;  %v329_v54 = vsub.s32 5, %v185_v24  ;;  %v347_v55 = vsub.s32 2, %v185_v24 }
  0x13   : > { %465 = vpow2.f32 %v433_v3  ;;  %v351_v56 = vsub.s32 6, %v185_v24  ;;  %v306_v57 = vrot.slane %v301_v52, %v305_v50  ;;  %v310_v58 = vrot.slane %v301_v52, %v309_v51 }
  0x14   : > { %v267_v33 = vmul.f32 132.0, %v266_v32  ;;  %v326_v60 = vrot.slane %v301_v52, %v325_v53  ;;  %v330_v61 = vrot.slane %v301_v52, %v329_v54  ;;  %v348_v62 = vrot.slane %v301_v52, %v347_v55 }
  0x15   : > { %v352_v63 = vrot.slane %v301_v52, %v351_v56  ;;  %v316_v2 = vrot.slane %v306_v57, %v305_v50  ;;  %v320_v3 = vrot.slane %v310_v58, %v305_v50 }
  0x1f   : > { %v464_v4 = vpop.eup %463 }
  0x20   : > { %v466_v5 = vpop.eup %465  ;;  %v153_v6 = vadd.f32 1.0, %v464_v4 }
  0x21   : > { %v154_v7 = vadd.f32 1.0, %v466_v5  ;;  %v336_v5 = vrot.slane %v326_v60, %v325_v53 }
  0x22   : > { %467 = vrcp.f32 %v153_v6  ;;  %v340_v6 = vrot.slane %v330_v61, %v325_v53 }
  0x23   : > { %469 = vrcp.f32 %v154_v7 }
  0x24   : > { %471 = vrcp.f32 %v267_v33 }
  0x2f   : > { %v468_v8 = vpop.eup %467 }
  0x30   : > { %161 = vrot.lane.b32.xlu0 %v468_v8, %s483_s15  ;;  %v470_v9 = vpop.eup %469 }
  0x31   : > { %v472_v34 = vpop.eup %471 }
  0x34   : > { %163 = vrot.lane.b32.xlu0 %v470_v9, %s483_s15  ;;  %v358_v9 = vrot.slane %v348_v62, %v347_v55 }
  0xa2   : > { %v162_v10 = vpop.permute.xlu0 %161 }
  0xa6   : > { %v164_v12 = vpop.permute.xlu0 %163 }
  0xa7   : > { %v166_v13 = vsel %vm165_vm0, %v162_v10, %v164_v12  ;;  %v518_v14 = vmul.f32 %v164_v12, %v145_v0  ;;  %v362_v10 = vrot.slane %v352_v63, %v347_v55 }
  0xa8   : > { %v520_v15 = vmul.f32 %v166_v13, %v144_v11 }
  0xa9   : > { %v172_v16 = vsel %vm171_vm1, %v518_v14, 0.0  ;;  %v177_v17 = vmul.f32 %v518_v14, %v518_v14 }
  0xaa   : > { %v173_v18 = vadd.f32 %v172_v16, %v520_v15  ;;  %v176_v19 = vmul.f32 %v520_v15, %v520_v15 }
  0xab   : > { %v178_v20 = vsel %vm171_vm1, %v177_v17, 0.0 }
  0xac   : > { %174 = vadd.xlane.f32.xlu1 %v173_v18  ;;  %v179_v21 = vadd.f32 %v178_v20, %v176_v19 }
  0xb0   : > { %180 = vadd.xlane.f32.xlu1 %v179_v21 }
 0x135   : > { %v175_v26 = vpop.xlane.xlu1 %174 }
 0x139   : > { %v181_v27 = vpop.xlane.xlu1 %180 }
 0x13a   : > { %v183_v29 = vsel %vm182_vm4, %v175_v26, %v181_v27 }
 0x13b   : > { %442 = vmatpush3.msra.mxu0 %v183_v29 }
 0x13c   : > { %444 = vmatmul.mubr.msk.f32.vlgmr.msra.gmra.mxu0 %vm191_vm5, %v434_v28 }
 0x1fc   : > { %v261_v35 = vpop.f32.mrf.mxu0 }
 0x1fd   : > { %v269_v36 = vmul.f32 %v472_v34, %v261_v35 }
 0x1fe   : > { %v445_v37 = vpop.f32.mrf.mxu0 }
 0x1ff   : > { %v270_v38 = vmul.f32 2.0, %v269_v36  ;;  %v278_v39 = vmul.f32 %v269_v36, %v269_v36 }
 0x201   : > { %v271_v40 = vmul.f32 %v270_v38, %v261_v35  ;;  %280 = vrot.lane.b32.xlu1 %v278_v39, %s487_s16 }
 0x203   : > { %273 = vrot.lane.b32.xlu0 %v271_v40, %s487_s16 }
 0x207   : > { %289 = vperm.xlu0 %461, %v269_v36  }
 0x20b   : > { %462 = vset.pattern.permute.xlu0 %v488_v41 }
 0x273   : > { %v281_v45 = vpop.permute.xlu1 %280 }
 0x275   : > { %v274_v42 = vpop.permute.xlu0 %273 }
 0x276   : > { %v276_v43 = vsub.f32 %v261_v35, %v274_v42 }
 0x278   : > { %v277_v44 = vmul.f32 %v472_v34, %v276_v43 }
 0x27a   : > { %v283_v46 = vadd.f32 %v281_v45, %v277_v44 }
 0x27c   : > { %v284_v47 = vmax.f32 %v283_v46, 0.0 }
 0x27e   : > { %v285_v48 = vadd.f32 1e-05, %v284_v47 }
 0x280   : > { %473 = vrsqrt.f32 %v285_v48 }
 0x282   : > { %v290_v59 = vpop.permute.xlu0 %289 }
 0x283   : > { %v292_v0 = vsub.f32 %v520_v15, %v290_v59  ;;  %v293_v1 = vsub.f32 %v518_v14, %v290_v59 }
 0x28d   : > { %v474_v49 = vpop.eup %473 }
 0x28e   : > { %296 = vperm.xlu0 %462, %v474_v49  }
 0x309   : > { %v297_v4 = vpop.permute.xlu0 %296 }
 0x30a   : > { %v299_v7 = vmul.f32 %v297_v4, %v292_v0  ;;  %v300_v8 = vmul.f32 %v297_v4, %v293_v1 }
 0x30c   : > { %v321_v11 = vmul.f32 %v316_v2, %v299_v7  ;;  %v322_v12 = vmul.f32 %v320_v3, %v300_v8 }
 0x30e   : > { %v341_v13 = vadd.f32 %v336_v5, %v321_v11  ;;  %v342_v16 = vadd.f32 %v340_v6, %v322_v12 }
 0x310   : > { %vm343_vm6 = vcmp.ge.f32.partialorder %v341_v13, 0.0  ;;  %vm344_vm7 = vcmp.ge.f32.partialorder %v342_v16, 0.0  ;;  %v363_v14 = vmul.f32 %v358_v9, %v341_v13  ;;  %v364_v15 = vmul.f32 %v362_v10, %v342_v16 }
 0x312   : > { %v365_v17 = vsel %vm343_vm6, %v341_v13, %v363_v14  ;;  %v366_v18 = vsel %vm344_vm7, %v342_v16, %v364_v15 }
 0x313   : > { %367 = vst [vmem:[%s143_s22] sm:$0xff] %v365_v17  ;;  %368 = vst.msk [vmem:[%s143_s22 + $0x8] sm:$0xff] %vm171_vm1, %v366_v18 }
 0x314 PF: > { %s12_s9 = sadd.s32 1, %s481_s9  }
 0x315   : > { %p9_p4 = scmp.ge.s32.totalorder %s12_s9, 4  }
 0x317   :  { %11 = sbr.rel (!%p9_p4) target bundleno = 1 (0x1), region = 58 }

// kernel: unet_encoder_forward.6
= control target key start
LH: loop header
LB: loop body
LE: loop exit
PB: predicated region body
PF: predicated region fallthrough
CT: control target
= control target key end

     0   :  { %s421_s9 = smov 0   ;;  %s451_s0 = inlined_call_operand.vmem [shape: f32[2,8,128], index: 0, kind: input, shape index: {}]   ;;  %s452_s1 = inlined_call_operand.vmem [shape: f32[3,64], index: 1, kind: input, shape index: {}]   ;;  %s453_s2 = inlined_call_operand.vmem [shape: f32[2,8,64], index: 2, kind: output, shape index: {}]  }
   0x1 LB: > { %s348_s10 = sadd.s32 4294967295, %s398_s9   ;;  %p352_p0 = scmp.ge.s32.totalorder %s398_s9, 1  ;;  %s398_s9 = sphi %s421_s9, %s12_s9  }
   0x2   : > { %p111_p1 = scmp.lt.s32.totalorder %s398_s9, 3 }
   0x4   : > { %p112_p2 = pnand %p352_p0, %p111_p1 }
   0x5   : > { %p131_p3 = scmp.lt.s32.totalorder (!%p112_p2), %s348_s10, 1  ;;  %s400_s15 = smov (!%p112_p2), 64  }
   0x6   : > { %115 = sbr.rel (%p112_p2) target bundleno = 779 (0x30b), region = 28  ;;  %s404_s16 = smov (!%p112_p2), 1  }
   0xb   : > { %s455_s10 = smov (!%p131_p3, %s348_s10), 1  ;;  %vm151_vm0 = vcmask 523264   ;;  %v401_v10 = vmov 0.0   ;;  %vm402_vm1 = vmmov 0   ;;  %v161_v11 = vlaneseq  ;;  %v276_v40 = vld [vmem:[%s452_s1] sm:$0x7] }
   0xc   : > { %s353_s11 = sshll.u32 %s455_s10, 3  ;;  %362 = vmatprep.subr.mxu0 %v401_v10  ;;  %364 = vmatprep.mubr.msk.f32.mxu0 %vm402_vm1, %v401_v10  ;;  %vm159_vm3 = vcmask 7168   ;;  %vm168_vm4 = vcmask 64512   ;;  %v403_v18 = vmov 0   ;;  %v405_v29 = vmov 1  }
   0xd   : > { %s134_s14 = scalar_lea.vmem %s451_s0, %s353_s11  ;;  %v162_v12 = vshrl.u32 %v161_v11, 7  ;;  %v164_v13 = vand.u32 127, %v161_v11  ;;  %381 = vset.pattern.permute.xlu1 %v403_v18  ;;  %383 = vset.pattern.permute.xlu0 %v405_v29  ;;  %s138_s21 = scalar_lea.vmem %s453_s2, %s353_s11 }
   0xe   : > { %v139_v0 = vld [vmem:[%s134_s14] sm:$0xff] }
   0xf   : > { %v355_v1 = vmul.f32 -1.442695, %v139_v0  ;;  %vm165_vm2 = vcmp.ge.s32.totalorder %v162_v12, %v164_v13  ;;  %v242_v19 = vcvt.s32.f32 %v162_v12  ;;  %v279_v38 = vsub.s32 0, %v162_v12 }
  0x10   : > { %v356_v16 = vsel %vm165_vm2, 1.0, %v401_v10  ;;  %v284_v41 = vsub.s32 1, %v162_v12  ;;  %v290_v44 = vsub.s32 2, %v162_v12 }
  0x11   : > { %384 = vpow2.f32 %v355_v1  ;;  %v243_v20 = vadd.f32 1.0, %v242_v19  ;;  %v280_v43 = vrot.slane %v276_v40, %v279_v38 }
  0x12   : > { %v285_v46 = vrot.slane %v276_v40, %v284_v41  ;;  %v291_v48 = vrot.slane %v276_v40, %v290_v44 }
  0x13   : > { %v244_v21 = vmul.f32 64.0, %v243_v20 }
  0x1e   : > { %v385_v2 = vpop.eup %384 }
  0x1f   : > { %v143_v3 = vadd.f32 1.0, %v385_v2 }
  0x21   : > { %386 = vrcp.f32 %v143_v3 }
  0x22   : > { %388 = vrcp.f32 %v244_v21 }
  0x2e   : > { %v387_v4 = vpop.eup %386 }
  0x2f   : > { %147 = vrot.lane.b32.xlu0 %v387_v4, %s400_s15  ;;  %v389_v22 = vpop.eup %388 }
  0xa1   : > { %v148_v5 = vpop.permute.xlu0 %147 }
  0xa2   : > { %v150_v6 = vmul.f32 %v148_v5, %v139_v0 }
  0xa4   : > { %v152_v7 = vsel %vm151_vm0, %v150_v6, 0.0  ;;  %v155_v8 = vmul.f32 %v150_v6, %v150_v6 }
  0xa5   : > { %153 = vadd.xlane.f32.xlu0 %v152_v7 }
  0xa6   : > { %v156_v9 = vsel %vm151_vm0, %v155_v8, 0.0 }
  0xa7   : > { %157 = vadd.xlane.f32.xlu1 %v156_v9 }
 0x12e   : > { %v154_v14 = vpop.xlane.xlu0 %153 }
 0x130   : > { %v158_v15 = vpop.xlane.xlu1 %157 }
 0x131   : > { %v160_v17 = vsel %vm159_vm3, %v154_v14, %v158_v15 }
 0x132   : > { %363 = vmatpush3.msra.mxu0 %v160_v17 }
 0x133   : > { %365 = vmatmul.mubr.msk.f32.vlgmr.msra.gmra.mxu0 %vm168_vm4, %v356_v16 }
 0x1f3   : > { %v238_v23 = vpop.f32.mrf.mxu0 }
 0x1f4   : > { %v246_v24 = vmul.f32 %v389_v22, %v238_v23 }
 0x1f5   : > { %v366_v25 = vpop.f32.mrf.mxu0 }
 0x1f6   : > { %v247_v26 = vmul.f32 2.0, %v246_v24  ;;  %v255_v28 = vmul.f32 %v246_v24, %v246_v24 }
 0x1f8   : > { %v248_v27 = vmul.f32 %v247_v26, %v238_v23 }
 0x1fa   : > { %250 = vrot.lane.b32.xlu1 %v248_v27, %s404_s16 }
 0x1fe   : > { %257 = vrot.lane.b32.xlu1 %v255_v28, %s404_s16 }
 0x202   : > { %266 = vperm.xlu1 %381, %v246_v24  }
 0x206   : > { %382 = vset.pattern.permute.xlu1 %v405_v29 }
 0x26c   : > { %v251_v30 = vpop.permute.xlu1 %250 }
 0x26d   : > { %v253_v31 = vsub.f32 %v238_v23, %v251_v30 }
 0x26f   : > { %v254_v32 = vmul.f32 %v389_v22, %v253_v31 }
 0x270   : > { %v258_v33 = vpop.permute.xlu1 %257 }
 0x271   : > { %v260_v34 = vadd.f32 %v258_v33, %v254_v32 }
 0x273   : > { %v261_v35 = vmax.f32 %v260_v34, 0.0 }
 0x275   : > { %v262_v36 = vadd.f32 1e-05, %v261_v35 }
 0x277   : > { %390 = vrsqrt.f32 %v262_v36 }
 0x27d   : > { %v267_v39 = vpop.permute.xlu1 %266 }
 0x27e   : > { %v269_v42 = vsub.f32 %v150_v6, %v267_v39 }
 0x284   : > { %v391_v37 = vpop.eup %390 }
 0x285   : > { %272 = vperm.xlu1 %382, %v391_v37  }
 0x300   : > { %v273_v45 = vpop.permute.xlu1 %272 }
 0x301   : > { %v275_v47 = vmul.f32 %v273_v45, %v269_v42 }
 0x303   : > { %v281_v49 = vmul.f32 %v280_v43, %v275_v47 }
 0x305   : > { %v286_v50 = vadd.f32 %v285_v46, %v281_v49 }
 0x307   : > { %vm287_vm5 = vcmp.ge.f32.partialorder %v286_v50, 0.0  ;;  %v292_v51 = vmul.f32 %v291_v48, %v286_v50 }
 0x309   : > { %v293_v52 = vsel %vm287_vm5, %v286_v50, %v292_v51 }
 0x30a   : > { %294 = vst.msk [vmem:[%s138_s21] sm:$0xff] %vm151_vm0, %v293_v52 }
 0x30b PF: > { %s12_s9 = sadd.s32 1, %s398_s9  }
 0x30c   : > { %p9_p4 = scmp.ge.s32.totalorder %s12_s9, 4  }
 0x30e   :  { %11 = sbr.rel (!%p9_p4) target bundleno = 1 (0x1), region = 58 }

// kernel: unet_encoder_forward.7
= control target key start
LH: loop header
LB: loop body
LE: loop exit
PB: predicated region body
PF: predicated region fallthrough
CT: control target
= control target key end

     0   :  { %s421_s9 = smov 0   ;;  %s451_s0 = inlined_call_operand.vmem [shape: f32[2,8,56], index: 0, kind: input, shape index: {}]   ;;  %s452_s1 = inlined_call_operand.vmem [shape: f32[3,28], index: 1, kind: input, shape index: {}]   ;;  %s453_s2 = inlined_call_operand.vmem [shape: f32[2,8,28], index: 2, kind: output, shape index: {}]  }
   0x1 LB: > { %s348_s10 = sadd.s32 4294967295, %s398_s9   ;;  %p352_p0 = scmp.ge.s32.totalorder %s398_s9, 1  ;;  %s398_s9 = sphi %s421_s9, %s12_s9  }
   0x2   : > { %p111_p1 = scmp.lt.s32.totalorder %s398_s9, 3 }
   0x4   : > { %p112_p2 = pnand %p352_p0, %p111_p1 }
   0x5   : > { %p131_p3 = scmp.lt.s32.totalorder (!%p112_p2), %s348_s10, 1  ;;  %s400_s15 = smov (!%p112_p2), 100  }
   0x6   : > { %115 = sbr.rel (%p112_p2) target bundleno = 779 (0x30b), region = 28  ;;  %s404_s16 = smov (!%p112_p2), 1  }
   0xb   : > { %s455_s10 = smov (!%p131_p3, %s348_s10), 1  ;;  %vm151_vm0 = vcmask 228352   ;;  %v401_v10 = vmov 0.0   ;;  %vm402_vm1 = vmmov 0   ;;  %v161_v11 = vlaneseq  ;;  %v276_v40 = vld [vmem:[%s452_s1] sm:$0x7] }
   0xc   : > { %s353_s11 = sshll.u32 %s455_s10, 3  ;;  %362 = vmatprep.subr.mxu0 %v401_v10  ;;  %364 = vmatprep.mubr.msk.f32.mxu0 %vm402_vm1, %v401_v10  ;;  %vm159_vm3 = vcmask 7168   ;;  %vm168_vm4 = vcmask 64512   ;;  %v403_v18 = vmov 0   ;;  %v405_v29 = vmov 1  }
   0xd   : > { %s134_s14 = scalar_lea.vmem %s451_s0, %s353_s11  ;;  %v162_v12 = vshrl.u32 %v161_v11, 7  ;;  %v164_v13 = vand.u32 127, %v161_v11  ;;  %381 = vset.pattern.permute.xlu1 %v403_v18  ;;  %383 = vset.pattern.permute.xlu0 %v405_v29  ;;  %s138_s21 = scalar_lea.vmem %s453_s2, %s353_s11 }
   0xe   : > { %v139_v0 = vld [vmem:[%s134_s14] sm:$0xff] }
   0xf   : > { %v355_v1 = vmul.f32 -1.442695, %v139_v0  ;;  %vm165_vm2 = vcmp.ge.s32.totalorder %v162_v12, %v164_v13  ;;  %v242_v19 = vcvt.s32.f32 %v162_v12  ;;  %v279_v38 = vsub.s32 0, %v162_v12 }
  0x10   : > { %v356_v16 = vsel %vm165_vm2, 1.0, %v401_v10  ;;  %v284_v41 = vsub.s32 1, %v162_v12  ;;  %v290_v44 = vsub.s32 2, %v162_v12 }
  0x11   : > { %384 = vpow2.f32 %v355_v1  ;;  %v243_v20 = vadd.f32 1.0, %v242_v19  ;;  %v280_v43 = vrot.slane %v276_v40, %v279_v38 }
  0x12   : > { %v285_v46 = vrot.slane %v276_v40, %v284_v41  ;;  %v291_v48 = vrot.slane %v276_v40, %v290_v44 }
  0x13   : > { %v244_v21 = vmul.f32 28.0, %v243_v20 }
  0x1e   : > { %v385_v2 = vpop.eup %384 }
  0x1f   : > { %v143_v3 = vadd.f32 1.0, %v385_v2 }
  0x21   : > { %386 = vrcp.f32 %v143_v3 }
  0x22   : > { %388 = vrcp.f32 %v244_v21 }
  0x2e   : > { %v387_v4 = vpop.eup %386 }
  0x2f   : > { %147 = vrot.lane.b32.xlu0 %v387_v4, %s400_s15  ;;  %v389_v22 = vpop.eup %388 }
  0xa1   : > { %v148_v5 = vpop.permute.xlu0 %147 }
  0xa2   : > { %v150_v6 = vmul.f32 %v148_v5, %v139_v0 }
  0xa4   : > { %v152_v7 = vsel %vm151_vm0, %v150_v6, 0.0  ;;  %v155_v8 = vmul.f32 %v150_v6, %v150_v6 }
  0xa5   : > { %153 = vadd.xlane.f32.xlu0 %v152_v7 }
  0xa6   : > { %v156_v9 = vsel %vm151_vm0, %v155_v8, 0.0 }
  0xa7   : > { %157 = vadd.xlane.f32.xlu1 %v156_v9 }
 0x12e   : > { %v154_v14 = vpop.xlane.xlu0 %153 }
 0x130   : > { %v158_v15 = vpop.xlane.xlu1 %157 }
 0x131   : > { %v160_v17 = vsel %vm159_vm3, %v154_v14, %v158_v15 }
 0x132   : > { %363 = vmatpush3.msra.mxu0 %v160_v17 }
 0x133   : > { %365 = vmatmul.mubr.msk.f32.vlgmr.msra.gmra.mxu0 %vm168_vm4, %v356_v16 }
 0x1f3   : > { %v238_v23 = vpop.f32.mrf.mxu0 }
 0x1f4   : > { %v246_v24 = vmul.f32 %v389_v22, %v238_v23 }
 0x1f5   : > { %v366_v25 = vpop.f32.mrf.mxu0 }
 0x1f6   : > { %v247_v26 = vmul.f32 2.0, %v246_v24  ;;  %v255_v28 = vmul.f32 %v246_v24, %v246_v24 }
 0x1f8   : > { %v248_v27 = vmul.f32 %v247_v26, %v238_v23 }
 0x1fa   : > { %250 = vrot.lane.b32.xlu1 %v248_v27, %s404_s16 }
 0x1fe   : > { %257 = vrot.lane.b32.xlu1 %v255_v28, %s404_s16 }
 0x202   : > { %266 = vperm.xlu1 %381, %v246_v24  }
 0x206   : > { %382 = vset.pattern.permute.xlu1 %v405_v29 }
 0x26c   : > { %v251_v30 = vpop.permute.xlu1 %250 }
 0x26d   : > { %v253_v31 = vsub.f32 %v238_v23, %v251_v30 }
 0x26f   : > { %v254_v32 = vmul.f32 %v389_v22, %v253_v31 }
 0x270   : > { %v258_v33 = vpop.permute.xlu1 %257 }
 0x271   : > { %v260_v34 = vadd.f32 %v258_v33, %v254_v32 }
 0x273   : > { %v261_v35 = vmax.f32 %v260_v34, 0.0 }
 0x275   : > { %v262_v36 = vadd.f32 1e-05, %v261_v35 }
 0x277   : > { %390 = vrsqrt.f32 %v262_v36 }
 0x27d   : > { %v267_v39 = vpop.permute.xlu1 %266 }
 0x27e   : > { %v269_v42 = vsub.f32 %v150_v6, %v267_v39 }
 0x284   : > { %v391_v37 = vpop.eup %390 }
 0x285   : > { %272 = vperm.xlu1 %382, %v391_v37  }
 0x300   : > { %v273_v45 = vpop.permute.xlu1 %272 }
 0x301   : > { %v275_v47 = vmul.f32 %v273_v45, %v269_v42 }
 0x303   : > { %v281_v49 = vmul.f32 %v280_v43, %v275_v47 }
 0x305   : > { %v286_v50 = vadd.f32 %v285_v46, %v281_v49 }
 0x307   : > { %vm287_vm5 = vcmp.ge.f32.partialorder %v286_v50, 0.0  ;;  %v292_v51 = vmul.f32 %v291_v48, %v286_v50 }
 0x309   : > { %v293_v52 = vsel %vm287_vm5, %v286_v50, %v292_v51 }
 0x30a   : > { %294 = vst.msk [vmem:[%s138_s21] sm:$0xff] %vm151_vm0, %v293_v52 }
 0x30b PF: > { %s12_s9 = sadd.s32 1, %s398_s9  }
 0x30c   : > { %p9_p4 = scmp.ge.s32.totalorder %s12_s9, 4  }
 0x30e   :  { %11 = sbr.rel (!%p9_p4) target bundleno = 1 (0x1), region = 58 }

// kernel: unet_encoder_forward.8
= control target key start
LH: loop header
LB: loop body
LE: loop exit
PB: predicated region body
PF: predicated region fallthrough
CT: control target
= control target key end

     0   :  { %s421_s9 = smov 0   ;;  %s451_s0 = inlined_call_operand.vmem [shape: f32[2,8,24], index: 0, kind: input, shape index: {}]   ;;  %s452_s1 = inlined_call_operand.vmem [shape: f32[3,12], index: 1, kind: input, shape index: {}]   ;;  %s453_s2 = inlined_call_operand.vmem [shape: f32[2,8,12], index: 2, kind: output, shape index: {}]  }
   0x1 LB: > { %s348_s10 = sadd.s32 4294967295, %s398_s9   ;;  %p352_p0 = scmp.ge.s32.totalorder %s398_s9, 1  ;;  %s398_s9 = sphi %s421_s9, %s12_s9  }
   0x2   : > { %p111_p1 = scmp.lt.s32.totalorder %s398_s9, 3 }
   0x4   : > { %p112_p2 = pnand %p352_p0, %p111_p1 }
   0x5   : > { %p131_p3 = scmp.lt.s32.totalorder (!%p112_p2), %s348_s10, 1  ;;  %s400_s15 = smov (!%p112_p2), 116  }
   0x6   : > { %115 = sbr.rel (%p112_p2) target bundleno = 779 (0x30b), region = 28  ;;  %s404_s16 = smov (!%p112_p2), 1  }
   0xb   : > { %s455_s10 = smov (!%p131_p3, %s348_s10), 1  ;;  %vm151_vm0 = vcmask 97280   ;;  %v401_v10 = vmov 0.0   ;;  %vm402_vm1 = vmmov 0   ;;  %v161_v11 = vlaneseq  ;;  %v276_v40 = vld [vmem:[%s452_s1] sm:$0x7] }
   0xc   : > { %s353_s11 = sshll.u32 %s455_s10, 3  ;;  %362 = vmatprep.subr.mxu0 %v401_v10  ;;  %364 = vmatprep.mubr.msk.f32.mxu0 %vm402_vm1, %v401_v10  ;;  %vm159_vm3 = vcmask 7168   ;;  %vm168_vm4 = vcmask 64512   ;;  %v403_v18 = vmov 0   ;;  %v405_v29 = vmov 1  }
   0xd   : > { %s134_s14 = scalar_lea.vmem %s451_s0, %s353_s11  ;;  %v162_v12 = vshrl.u32 %v161_v11, 7  ;;  %v164_v13 = vand.u32 127, %v161_v11  ;;  %381 = vset.pattern.permute.xlu1 %v403_v18  ;;  %383 = vset.pattern.permute.xlu0 %v405_v29  ;;  %s138_s21 = scalar_lea.vmem %s453_s2, %s353_s11 }
   0xe   : > { %v139_v0 = vld [vmem:[%s134_s14] sm:$0xff] }
   0xf   : > { %v355_v1 = vmul.f32 -1.442695, %v139_v0  ;;  %vm165_vm2 = vcmp.ge.s32.totalorder %v162_v12, %v164_v13  ;;  %v242_v19 = vcvt.s32.f32 %v162_v12  ;;  %v279_v38 = vsub.s32 0, %v162_v12 }
  0x10   : > { %v356_v16 = vsel %vm165_vm2, 1.0, %v401_v10  ;;  %v284_v41 = vsub.s32 1, %v162_v12  ;;  %v290_v44 = vsub.s32 2, %v162_v12 }
  0x11   : > { %384 = vpow2.f32 %v355_v1  ;;  %v243_v20 = vadd.f32 1.0, %v242_v19  ;;  %v280_v43 = vrot.slane %v276_v40, %v279_v38 }
  0x12   : > { %v285_v46 = vrot.slane %v276_v40, %v284_v41  ;;  %v291_v48 = vrot.slane %v276_v40, %v290_v44 }
  0x13   : > { %v244_v21 = vmul.f32 12.0, %v243_v20 }
  0x1e   : > { %v385_v2 = vpop.eup %384 }
  0x1f   : > { %v143_v3 = vadd.f32 1.0, %v385_v2 }
  0x21   : > { %386 = vrcp.f32 %v143_v3 }
  0x22   : > { %388 = vrcp.f32 %v244_v21 }
  0x2e   : > { %v387_v4 = vpop.eup %386 }
  0x2f   : > { %147 = vrot.lane.b32.xlu0 %v387_v4, %s400_s15  ;;  %v389_v22 = vpop.eup %388 }
  0xa1   : > { %v148_v5 = vpop.permute.xlu0 %147 }
  0xa2   : > { %v150_v6 = vmul.f32 %v148_v5, %v139_v0 }
  0xa4   : > { %v152_v7 = vsel %vm151_vm0, %v150_v6, 0.0  ;;  %v155_v8 = vmul.f32 %v150_v6, %v150_v6 }
  0xa5   : > { %153 = vadd.xlane.f32.xlu0 %v152_v7 }
  0xa6   : > { %v156_v9 = vsel %vm151_vm0, %v155_v8, 0.0 }
  0xa7   : > { %157 = vadd.xlane.f32.xlu1 %v156_v9 }
 0x12e   : > { %v154_v14 = vpop.xlane.xlu0 %153 }
 0x130   : > { %v158_v15 = vpop.xlane.xlu1 %157 }
 0x131   : > { %v160_v17 = vsel %vm159_vm3, %v154_v14, %v158_v15 }
 0x132   : > { %363 = vmatpush3.msra.mxu0 %v160_v17 }
 0x133   : > { %365 = vmatmul.mubr.msk.f32.vlgmr.msra.gmra.mxu0 %vm168_vm4, %v356_v16 }
 0x1f3   : > { %v238_v23 = vpop.f32.mrf.mxu0 }
 0x1f4   : > { %v246_v24 = vmul.f32 %v389_v22, %v238_v23 }
 0x1f5   : > { %v366_v25 = vpop.f32.mrf.mxu0 }
 0x1f6   : > { %v247_v26 = vmul.f32 2.0, %v246_v24  ;;  %v255_v28 = vmul.f32 %v246_v24, %v246_v24 }
 0x1f8   : > { %v248_v27 = vmul.f32 %v247_v26, %v238_v23 }
 0x1fa   : > { %250 = vrot.lane.b32.xlu1 %v248_v27, %s404_s16 }
 0x1fe   : > { %257 = vrot.lane.b32.xlu1 %v255_v28, %s404_s16 }
 0x202   : > { %266 = vperm.xlu1 %381, %v246_v24  }
 0x206   : > { %382 = vset.pattern.permute.xlu1 %v405_v29 }
 0x26c   : > { %v251_v30 = vpop.permute.xlu1 %250 }
 0x26d   : > { %v253_v31 = vsub.f32 %v238_v23, %v251_v30 }
 0x26f   : > { %v254_v32 = vmul.f32 %v389_v22, %v253_v31 }
 0x270   : > { %v258_v33 = vpop.permute.xlu1 %257 }
 0x271   : > { %v260_v34 = vadd.f32 %v258_v33, %v254_v32 }
 0x273   : > { %v261_v35 = vmax.f32 %v260_v34, 0.0 }
 0x275   : > { %v262_v36 = vadd.f32 1e-05, %v261_v35 }
 0x277   : > { %390 = vrsqrt.f32 %v262_v36 }
 0x27d   : > { %v267_v39 = vpop.permute.xlu1 %266 }
 0x27e   : > { %v269_v42 = vsub.f32 %v150_v6, %v267_v39 }
 0x284   : > { %v391_v37 = vpop.eup %390 }
 0x285   : > { %272 = vperm.xlu1 %382, %v391_v37  }
 0x300   : > { %v273_v45 = vpop.permute.xlu1 %272 }
 0x301   : > { %v275_v47 = vmul.f32 %v273_v45, %v269_v42 }
 0x303   : > { %v281_v49 = vmul.f32 %v280_v43, %v275_v47 }
 0x305   : > { %v286_v50 = vadd.f32 %v285_v46, %v281_v49 }
 0x307   : > { %vm287_vm5 = vcmp.ge.f32.partialorder %v286_v50, 0.0  ;;  %v292_v51 = vmul.f32 %v291_v48, %v286_v50 }
 0x309   : > { %v293_v52 = vsel %vm287_vm5, %v286_v50, %v292_v51 }
 0x30a   : > { %294 = vst.msk [vmem:[%s138_s21] sm:$0xff] %vm151_vm0, %v293_v52 }
 0x30b PF: > { %s12_s9 = sadd.s32 1, %s398_s9  }
 0x30c   : > { %p9_p4 = scmp.ge.s32.totalorder %s12_s9, 4  }
 0x30e   :  { %11 = sbr.rel (!%p9_p4) target bundleno = 1 (0x1), region = 58 }

</bundles_post_ra>
